<compile_context>
chip_gen: v7x
topology: tpu7x:2x2x1
jax: 0.10.0
libtpu: 0.0.40
codegen_flags: <defaults>
</compile_context>

<pallas_src>
import functools

import jax
import jax.numpy as jnp
import numpy as np
from jax.experimental import pallas as pl
from jax.experimental.pallas import tpu as pltpu


def _dc_share_adapter_kernel(
    x_ref,       # (BR, H)   BR = B_blk * L rows of batch-first flattened input
    w1t_ref,     # (H, E)    l1.weight^T            (pre-transposed on host)
    b1_ref,      # (1, E)
    wint_ref,    # (E, 3E)   in_proj_weight^T
    bin_ref,     # (1, 3E)
    wot_ref,     # (E, E)    out_proj.weight^T
    bo_ref,      # (1, E)
    w2t_ref,     # (E, H)    l2.weight^T
    b2_ref,      # (1, H)
    alpha_ref,   # (1, 1)    sigmoid(gate1), precomputed on host
    o_ref,       # (BR, H)
    attn_cat_ref,  # VMEM scratch (BR, E) f32 -- concat of per-head outputs
    *,
    num_heads,
    seq_len,
    b_blk,
    mm_dtype,
):
    f32 = jnp.float32
    x = x_ref[...]                               # (BR, H)
    H = x.shape[-1]
    E = H // 2
    hd = E // num_heads
    scale = 1.0 / float(np.sqrt(hd))

    # ---- l1: one full-width matmul over all B_blk*L rows ----
    x1 = jnp.dot(x.astype(mm_dtype), w1t_ref[...],
                 preferred_element_type=f32) + b1_ref[...]            # (BR, E) f32

    # ---- fused qkv projection ----
    qkv = jnp.dot(x1.astype(mm_dtype), wint_ref[...],
                  preferred_element_type=f32) + bin_ref[...]          # (BR, 3E) f32
    q = qkv[:, :E] * scale
    k = qkv[:, E:2 * E]
    v = qkv[:, 2 * E:]

    # ---- per-(batch-element, head) attention ----
    # Static Python loops (B_blk, num_heads are small; keep unrolled for 2-4
    # heads per the playbook).  Head outputs are written into a shared VMEM
    # scratch so the out-projection below is a single fused MXU matmul.
    for b in range(b_blk):
        r = slice(b * seq_len, (b + 1) * seq_len)
        for h in range(num_heads):
            c = slice(h * hd, (h + 1) * hd)
            qh = q[r, c].astype(mm_dtype)
            kh = k[r, c].astype(mm_dtype)
            vh = v[r, c].astype(mm_dtype)
            # q . k^T without an explicit transpose (contract last dims).
            s = jax.lax.dot_general(qh, kh, (((1,), (1,)), ((), ())),
                                    preferred_element_type=f32)       # (L, L)
            s = s - jnp.max(s, axis=-1, keepdims=True)
            p = jnp.exp(s)
            # reciprocal + multiply instead of a per-element divide
            p = p * pl.reciprocal(jnp.sum(p, axis=-1, keepdims=True))
            oh = jnp.dot(p.astype(mm_dtype), vh,
                         preferred_element_type=f32)                  # (L, hd)
            attn_cat_ref[r, c] = oh

    # ---- single fused out-projection: (BR, E) @ (E, E) ----
    attn_out = jnp.dot(attn_cat_ref[...].astype(mm_dtype), wot_ref[...],
                       preferred_element_type=f32) + bo_ref[...]      # (BR, E)

    # ---- gated mix (F.gelu(x1) is dead code in the reference; omitted) ----
    alpha = alpha_ref[...]                                            # (1, 1) f32
    attn = alpha * attn_out + (1.0 - alpha) * x1

    # ---- l2 + residual ----
    y = jnp.dot(attn.astype(mm_dtype), w2t_ref[...],
                preferred_element_type=f32) + b2_ref[...]             # (BR, H)
    o_ref[...] = (y + x.astype(f32)).astype(o_ref.dtype)


def _choose_batch_block(n, l, max_rows=512):
    """Largest divisor of n whose block keeps (8,128)-legal rows, fits a modest
    VMEM budget, and (when possible) leaves >= 2 grid steps for megacore."""
    divs = [d for d in range(1, n + 1) if n % d == 0]
    legal = [d for d in divs if (d * l) % 8 == 0 or d == n]
    fits = [d for d in legal if d * l <= max_rows] or [min(legal)]
    multi = [d for d in fits if n // d >= 2]
    return max(multi) if multi else max(fits)


def dc_share_adapter(x, params, num_heads, *, batch_first=False,
                     block_batch=None, matmul_dtype=None,
                     vmem_limit_bytes=None):
    """DCShareAdapter forward.

    x: (L, N, H) seq-first (like the PyTorch module) unless batch_first=True,
       in which case x is (N, L, H) and the wrapper transposes are skipped.
    params: (l1.w (E,H), l1.b (1,E), in_proj_w (3E,E), in_proj_b (1,3E),
             out_proj.w (E,E), out_proj.b (1,E), l2.w (H,E), l2.b (1,H),
             gate1 (1,1)).
    matmul_dtype: e.g. jnp.bfloat16 to feed the MXU bf16 operands
                  (accumulation stays f32).  Default: x.dtype.
    """
    w1, b1, win, bin_, wo, bo, w2, b2, gate = params

    xb = x if batch_first else jnp.transpose(x, (1, 0, 2))   # (N, L, H)
    N, L, H = xb.shape
    E = H // 2
    assert H % 2 == 0 and E % num_heads == 0

    mm_dtype = x.dtype if matmul_dtype is None else matmul_dtype
    f32 = jnp.float32

    # One-time host-side parameter prep: transposes, optional bf16 cast,
    # sigmoid(gate).  Nothing of this runs per grid step inside the kernel.
    w1t = w1.T.astype(mm_dtype)            # (H, E)
    wint = win.T.astype(mm_dtype)          # (E, 3E)
    wot = wo.T.astype(mm_dtype)            # (E, E)
    w2t = w2.T.astype(mm_dtype)            # (E, H)
    b1r = b1.reshape(1, E).astype(f32)
    binr = bin_.reshape(1, 3 * E).astype(f32)
    bor = bo.reshape(1, E).astype(f32)
    b2r = b2.reshape(1, H).astype(f32)
    alpha = jax.nn.sigmoid(gate.reshape(1, 1).astype(f32))

    b_blk = _choose_batch_block(N, L) if block_batch is None else block_batch
    assert N % b_blk == 0
    BR = b_blk * L
    rows = N * L
    x2d = xb.reshape(rows, H)

    kernel = functools.partial(
        _dc_share_adapter_kernel,
        num_heads=num_heads, seq_len=L, b_blk=b_blk, mm_dtype=mm_dtype)

    def full(shape):
        return pl.BlockSpec(shape, lambda i: (0,) * len(shape))

    out2d = pl.pallas_call(
        kernel,
        out_shape=jax.ShapeDtypeStruct((rows, H), x.dtype),
        grid=(N // b_blk,),
        in_specs=[
            pl.BlockSpec((BR, H), lambda i: (i, 0)),
            full((H, E)), full((1, E)),
            full((E, 3 * E)), full((1, 3 * E)),
            full((E, E)), full((1, E)),
            full((E, H)), full((1, H)),
            full((1, 1)),
        ],
        out_specs=pl.BlockSpec((BR, H), lambda i: (i, 0)),
        scratch_shapes=[pltpu.VMEM((BR, E), jnp.float32)],
        compiler_params=pltpu.CompilerParams(
            dimension_semantics=("parallel",),
            vmem_limit_bytes=vmem_limit_bytes),
    )(x2d, w1t, b1r, wint, binr, wot, bor, w2t, b2r, alpha)

    outb = out2d.reshape(N, L, H)
    return outb if batch_first else jnp.transpose(outb, (1, 0, 2))


def dc_share_adapter_ref(x_lnh, params, num_heads):
    """Pure-JAX f32 reference (mirrors the PyTorch forward)."""
    w1, b1, win, bin_, wo, bo, w2, b2, gate = params
    L, N, H = x_lnh.shape
    E = H // 2
    hd = E // num_heads

    x1 = x_lnh @ w1.T + b1[0]                     # (L, N, E)
    qkv = x1 @ win.T + bin_[0]                    # (L, N, 3E)
    q, k, v = qkv[..., :E], qkv[..., E:2 * E], qkv[..., 2 * E:]
    qh = q.reshape(L, N, num_heads, hd)
    kh = k.reshape(L, N, num_heads, hd)
    vh = v.reshape(L, N, num_heads, hd)
    s = jnp.einsum('qnhd,knhd->nhqk', qh, kh) / np.sqrt(hd)
    p = jax.nn.softmax(s, axis=-1)
    o = jnp.einsum('nhqk,knhd->qnhd', p, vh).reshape(L, N, E)
    attn_out = o @ wo.T + bo[0]
    alpha = jax.nn.sigmoid(gate[0, 0])
    attn = alpha * attn_out + (1.0 - alpha) * x1
    return attn @ w2.T + b2[0] + x_lnh


def _make_params(key, hidden_dim, num_heads):
    E = hidden_dim // 2
    ks = jax.random.split(key, 8)
    f32 = jnp.float32
    # Deterministic synthetic parameters (random instead of the zero-init l2,
    # so the kernel's math path is actually exercised).
    return (
        jax.random.normal(ks[0], (E, hidden_dim), f32) * 0.1,        # l1.weight
        jax.random.normal(ks[1], (1, E), f32) * 0.1,                 # l1.bias
        jax.random.normal(ks[2], (3 * E, E), f32) * 0.1,             # in_proj_weight
        jax.random.normal(ks[3], (1, 3 * E), f32) * 0.1,             # in_proj_bias
        jax.random.normal(ks[4], (E, E), f32) * 0.1,                 # out_proj.weight
        jax.random.normal(ks[5], (1, E), f32) * 0.1,                 # out_proj.bias
        jax.random.normal(ks[6], (hidden_dim, E), f32) * 0.1,        # l2.weight
        jax.random.normal(ks[7], (1, hidden_dim), f32) * 0.1,        # l2.bias
        jnp.full((1, 1), 0.6, f32),                                  # gate1
    )


if __name__ == "__main__":
    key = jax.random.PRNGKey(0)
    k1, k2, k3, k4 = jax.random.split(key, 4)

    # --- config 1: small shapes, f32 MXU operands, tight tolerance -----------
    H1, heads1, L1, N1 = 32, 2, 8, 4          # -> B_blk=2, grid of 2 steps
    params1 = _make_params(k1, H1, heads1)
    x1 = jax.random.normal(k2, (L1, N1, H1), jnp.float32)     # (L, N, H) seq-first
    out1 = jax.block_until_ready(dc_share_adapter(x1, params1, heads1))
    ref1 = dc_share_adapter_ref(x1, params1, heads1)
    assert out1.shape == (L1, N1, H1)
    np.testing.assert_allclose(np.asarray(out1), np.asarray(ref1),
                               rtol=1e-4, atol=1e-4)

    # --- config 2: lane-dense H=128, bigger block, f32 then bf16 MXU path ----
    H2, heads2, L2, N2 = 128, 4, 16, 8        # -> B_blk=4, grid of 2 steps
    params2 = _make_params(k3, H2, heads2)
    x2 = jax.random.normal(k4, (L2, N2, H2), jnp.float32)
    ref2 = dc_share_adapter_ref(x2, params2, heads2)

    out2 = jax.block_until_ready(dc_share_adapter(x2, params2, heads2))
    np.testing.assert_allclose(np.asarray(out2), np.asarray(ref2),
                               rtol=1e-4, atol=1e-4)

    # bf16 MXU operands (f32 accumulation): loose sanity tolerance only; the
    # exact-precision path is validated above.
    out2_bf16 = jax.block_until_ready(
        dc_share_adapter(x2, params2, heads2, matmul_dtype=jnp.bfloat16))
    assert out2_bf16.shape == (L2, N2, H2)
    np.testing.assert_allclose(np.asarray(out2_bf16), np.asarray(ref2),
                               rtol=1e-1, atol=1e-1)

    print("KERNEL_OK")
</pallas_src>

<mosaic_0001>
module attributes {stable_mosaic.version = 11 : i64} {
  func.func @_dc_share_adapter_kernel(%arg0: i32, %arg1: memref<16x32xf32, #tpu.memory_space<vmem>>, %arg2: memref<32x16xf32, #tpu.memory_space<vmem>>, %arg3: memref<1x16xf32, #tpu.memory_space<vmem>>, %arg4: memref<16x48xf32, #tpu.memory_space<vmem>>, %arg5: memref<1x48xf32, #tpu.memory_space<vmem>>, %arg6: memref<16x16xf32, #tpu.memory_space<vmem>>, %arg7: memref<1x16xf32, #tpu.memory_space<vmem>>, %arg8: memref<16x32xf32, #tpu.memory_space<vmem>>, %arg9: memref<1x32xf32, #tpu.memory_space<vmem>>, %arg10: memref<1x1xf32, #tpu.memory_space<vmem>>, %arg11: memref<16x32xf32, #tpu.memory_space<vmem>>, %arg12: memref<16x16xf32, #tpu.memory_space<vmem>>) attributes {dimension_semantics = [#tpu.dimension_semantics<parallel>], iteration_bounds = array<i64: 2>, scalar_prefetch = 0 : i64, scratch_operands = 1 : i64, tpu.core_type = #tpu.core_type<tc>, window_params = [{transform_indices = @transform_0, window_bounds = array<i64: 16, 32>}, {pipeline_mode = #tpu.pipeline_mode<synchronous>, transform_indices = @transform_1, window_bounds = array<i64: 32, 16>}, {pipeline_mode = #tpu.pipeline_mode<synchronous>, transform_indices = @transform_2, window_bounds = array<i64: 1, 16>}, {pipeline_mode = #tpu.pipeline_mode<synchronous>, transform_indices = @transform_3, window_bounds = array<i64: 16, 48>}, {pipeline_mode = #tpu.pipeline_mode<synchronous>, transform_indices = @transform_4, window_bounds = array<i64: 1, 48>}, {pipeline_mode = #tpu.pipeline_mode<synchronous>, transform_indices = @transform_5, window_bounds = array<i64: 16, 16>}, {pipeline_mode = #tpu.pipeline_mode<synchronous>, transform_indices = @transform_6, window_bounds = array<i64: 1, 16>}, {pipeline_mode = #tpu.pipeline_mode<synchronous>, transform_indices = @transform_7, window_bounds = array<i64: 16, 32>}, {pipeline_mode = #tpu.pipeline_mode<synchronous>, transform_indices = @transform_8, window_bounds = array<i64: 1, 32>}, {pipeline_mode = #tpu.pipeline_mode<synchronous>, transform_indices = @transform_9, window_bounds = array<i64: 1, 1>}, {transform_indices = @transform_10, window_bounds = array<i64: 16, 32>}]} {
    %c0 = arith.constant 0 : index
    %c0_0 = arith.constant 0 : index
    %0 = vector.load %arg1[%c0, %c0_0] : memref<16x32xf32, #tpu.memory_space<vmem>>, vector<16x32xf32>
    %c0_1 = arith.constant 0 : index
    %c0_2 = arith.constant 0 : index
    %1 = vector.load %arg2[%c0_1, %c0_2] : memref<32x16xf32, #tpu.memory_space<vmem>>, vector<32x16xf32>
    %cst = arith.constant dense<0.000000e+00> : vector<16x16xf32>
    %2 = tpu.matmul %0, %1, %cst {dimension_numbers = #tpu.dot_dimension_numbers<[1], [0], [0], [1], [0, 0, 1, 1], [], []>} : vector<16x32xf32>, vector<32x16xf32>, vector<16x16xf32> -> vector<16x16xf32>
    %c0_3 = arith.constant 0 : index
    %c0_4 = arith.constant 0 : index
    %3 = vector.load %arg3[%c0_3, %c0_4] : memref<1x16xf32, #tpu.memory_space<vmem>>, vector<1x16xf32>
    %4 = vector.broadcast %3 : vector<1x16xf32> to vector<16x16xf32>
    %5 = arith.addf %2, %4 : vector<16x16xf32>
    %c0_5 = arith.constant 0 : index
    %c0_6 = arith.constant 0 : index
    %6 = vector.load %arg4[%c0_5, %c0_6] : memref<16x48xf32, #tpu.memory_space<vmem>>, vector<16x48xf32>
    %cst_7 = arith.constant dense<0.000000e+00> : vector<16x48xf32>
    %7 = tpu.matmul %5, %6, %cst_7 {dimension_numbers = #tpu.dot_dimension_numbers<[1], [0], [0], [1], [0, 0, 1, 1], [], []>} : vector<16x16xf32>, vector<16x48xf32>, vector<16x48xf32> -> vector<16x48xf32>
    %c0_8 = arith.constant 0 : index
    %c0_9 = arith.constant 0 : index
    %8 = vector.load %arg5[%c0_8, %c0_9] : memref<1x48xf32, #tpu.memory_space<vmem>>, vector<1x48xf32>
    %9 = vector.broadcast %8 : vector<1x48xf32> to vector<16x48xf32>
    %10 = arith.addf %7, %9 : vector<16x48xf32>
    %11 = vector.extract_strided_slice %10 {offsets = [0, 0], sizes = [16, 16], strides = [1, 1]} : vector<16x48xf32> to vector<16x16xf32>
    %cst_10 = arith.constant 0.353553385 : f32
    %12 = vector.broadcast %cst_10 : f32 to vector<16x16xf32>
    %13 = arith.mulf %11, %12 : vector<16x16xf32>
    %14 = vector.extract_strided_slice %10 {offsets = [0, 16], sizes = [16, 16], strides = [1, 1]} : vector<16x48xf32> to vector<16x16xf32>
    %15 = vector.extract_strided_slice %10 {offsets = [0, 32], sizes = [16, 16], strides = [1, 1]} : vector<16x48xf32> to vector<16x16xf32>
    %16 = vector.extract_strided_slice %13 {offsets = [0, 0], sizes = [8, 8], strides = [1, 1]} : vector<16x16xf32> to vector<8x8xf32>
    %17 = vector.extract_strided_slice %14 {offsets = [0, 0], sizes = [8, 8], strides = [1, 1]} : vector<16x16xf32> to vector<8x8xf32>
    %18 = vector.extract_strided_slice %15 {offsets = [0, 0], sizes = [8, 8], strides = [1, 1]} : vector<16x16xf32> to vector<8x8xf32>
    %cst_11 = arith.constant dense<0.000000e+00> : vector<8x8xf32>
    %19 = tpu.matmul %16, %17, %cst_11 {dimension_numbers = #tpu.dot_dimension_numbers<[1], [1], [0], [0], [0, 0, 1, 0], [], []>} : vector<8x8xf32>, vector<8x8xf32>, vector<8x8xf32> -> vector<8x8xf32>
    %cst_12 = arith.constant dense<0xFF800000> : vector<8xf32>
    %20 = vector.multi_reduction <maximumf>, %19, %cst_12 [1] : vector<8x8xf32> to vector<8xf32>
    %21 = vector.shape_cast %20 : vector<8xf32> to vector<8x1xf32>
    %22 = vector.broadcast %21 : vector<8x1xf32> to vector<8x8xf32>
    %23 = arith.subf %19, %22 : vector<8x8xf32>
    %24 = math.exp %23 : vector<8x8xf32>
    %cst_13 = arith.constant dense<0.000000e+00> : vector<8xf32>
    %25 = vector.multi_reduction <add>, %24, %cst_13 [1] : vector<8x8xf32> to vector<8xf32>
    %26 = vector.shape_cast %25 : vector<8xf32> to vector<8x1xf32>
    %27 = tpu.reciprocal %26 : vector<8x1xf32> -> vector<8x1xf32>
    %28 = vector.broadcast %27 : vector<8x1xf32> to vector<8x8xf32>
    %29 = arith.mulf %24, %28 : vector<8x8xf32>
    %cst_14 = arith.constant dense<0.000000e+00> : vector<8x8xf32>
    %30 = tpu.matmul %29, %18, %cst_14 {dimension_numbers = #tpu.dot_dimension_numbers<[1], [0], [0], [1], [0, 0, 1, 1], [], []>} : vector<8x8xf32>, vector<8x8xf32>, vector<8x8xf32> -> vector<8x8xf32>
    %c0_15 = arith.constant 0 : index
    %c0_16 = arith.constant 0 : index
    %31 = vector.load %arg12[%c0_15, %c0_16] : memref<16x16xf32, #tpu.memory_space<vmem>>, vector<8x8xf32>
    tpu.vector_store %arg12[%c0_15, %c0_16], %30 {strides = array<i32>} : memref<16x16xf32, #tpu.memory_space<vmem>>, vector<8x8xf32>,
    %32 = vector.extract_strided_slice %13 {offsets = [0, 8], sizes = [8, 8], strides = [1, 1]} : vector<16x16xf32> to vector<8x8xf32>
    %33 = vector.extract_strided_slice %14 {offsets = [0, 8], sizes = [8, 8], strides = [1, 1]} : vector<16x16xf32> to vector<8x8xf32>
    %34 = vector.extract_strided_slice %15 {offsets = [0, 8], sizes = [8, 8], strides = [1, 1]} : vector<16x16xf32> to vector<8x8xf32>
    %cst_17 = arith.constant dense<0.000000e+00> : vector<8x8xf32>
    %35 = tpu.matmul %32, %33, %cst_17 {dimension_numbers = #tpu.dot_dimension_numbers<[1], [1], [0], [0], [0, 0, 1, 0], [], []>} : vector<8x8xf32>, vector<8x8xf32>, vector<8x8xf32> -> vector<8x8xf32>
    %cst_18 = arith.constant dense<0xFF800000> : vector<8xf32>
    %36 = vector.multi_reduction <maximumf>, %35, %cst_18 [1] : vector<8x8xf32> to vector<8xf32>
    %37 = vector.shape_cast %36 : vector<8xf32> to vector<8x1xf32>
    %38 = vector.broadcast %37 : vector<8x1xf32> to vector<8x8xf32>
    %39 = arith.subf %35, %38 : vector<8x8xf32>
    %40 = math.exp %39 : vector<8x8xf32>
    %cst_19 = arith.constant dense<0.000000e+00> : vector<8xf32>
    %41 = vector.multi_reduction <add>, %40, %cst_19 [1] : vector<8x8xf32> to vector<8xf32>
    %42 = vector.shape_cast %41 : vector<8xf32> to vector<8x1xf32>
    %43 = tpu.reciprocal %42 : vector<8x1xf32> -> vector<8x1xf32>
    %44 = vector.broadcast %43 : vector<8x1xf32> to vector<8x8xf32>
    %45 = arith.mulf %40, %44 : vector<8x8xf32>
    %cst_20 = arith.constant dense<0.000000e+00> : vector<8x8xf32>
    %46 = tpu.matmul %45, %34, %cst_20 {dimension_numbers = #tpu.dot_dimension_numbers<[1], [0], [0], [1], [0, 0, 1, 1], [], []>} : vector<8x8xf32>, vector<8x8xf32>, vector<8x8xf32> -> vector<8x8xf32>
    %c0_21 = arith.constant 0 : index
    %c8 = arith.constant 8 : index
    %47 = vector.load %arg12[%c0_21, %c8] : memref<16x16xf32, #tpu.memory_space<vmem>>, vector<8x8xf32>
    tpu.vector_store %arg12[%c0_21, %c8], %46 {strides = array<i32>} : memref<16x16xf32, #tpu.memory_space<vmem>>, vector<8x8xf32>,
    %48 = vector.extract_strided_slice %13 {offsets = [8, 0], sizes = [8, 8], strides = [1, 1]} : vector<16x16xf32> to vector<8x8xf32>
    %49 = vector.extract_strided_slice %14 {offsets = [8, 0], sizes = [8, 8], strides = [1, 1]} : vector<16x16xf32> to vector<8x8xf32>
    %50 = vector.extract_strided_slice %15 {offsets = [8, 0], sizes = [8, 8], strides = [1, 1]} : vector<16x16xf32> to vector<8x8xf32>
    %cst_22 = arith.constant dense<0.000000e+00> : vector<8x8xf32>
    %51 = tpu.matmul %48, %49, %cst_22 {dimension_numbers = #tpu.dot_dimension_numbers<[1], [1], [0], [0], [0, 0, 1, 0], [], []>} : vector<8x8xf32>, vector<8x8xf32>, vector<8x8xf32> -> vector<8x8xf32>
    %cst_23 = arith.constant dense<0xFF800000> : vector<8xf32>
    %52 = vector.multi_reduction <maximumf>, %51, %cst_23 [1] : vector<8x8xf32> to vector<8xf32>
    %53 = vector.shape_cast %52 : vector<8xf32> to vector<8x1xf32>
    %54 = vector.broadcast %53 : vector<8x1xf32> to vector<8x8xf32>
    %55 = arith.subf %51, %54 : vector<8x8xf32>
    %56 = math.exp %55 : vector<8x8xf32>
    %cst_24 = arith.constant dense<0.000000e+00> : vector<8xf32>
    %57 = vector.multi_reduction <add>, %56, %cst_24 [1] : vector<8x8xf32> to vector<8xf32>
    %58 = vector.shape_cast %57 : vector<8xf32> to vector<8x1xf32>
    %59 = tpu.reciprocal %58 : vector<8x1xf32> -> vector<8x1xf32>
    %60 = vector.broadcast %59 : vector<8x1xf32> to vector<8x8xf32>
    %61 = arith.mulf %56, %60 : vector<8x8xf32>
    %cst_25 = arith.constant dense<0.000000e+00> : vector<8x8xf32>
    %62 = tpu.matmul %61, %50, %cst_25 {dimension_numbers = #tpu.dot_dimension_numbers<[1], [0], [0], [1], [0, 0, 1, 1], [], []>} : vector<8x8xf32>, vector<8x8xf32>, vector<8x8xf32> -> vector<8x8xf32>
    %c8_26 = arith.constant 8 : index
    %c0_27 = arith.constant 0 : index
    %63 = vector.load %arg12[%c8_26, %c0_27] : memref<16x16xf32, #tpu.memory_space<vmem>>, vector<8x8xf32>
    tpu.vector_store %arg12[%c8_26, %c0_27], %62 {strides = array<i32>} : memref<16x16xf32, #tpu.memory_space<vmem>>, vector<8x8xf32>,
    %64 = vector.extract_strided_slice %13 {offsets = [8, 8], sizes = [8, 8], strides = [1, 1]} : vector<16x16xf32> to vector<8x8xf32>
    %65 = vector.extract_strided_slice %14 {offsets = [8, 8], sizes = [8, 8], strides = [1, 1]} : vector<16x16xf32> to vector<8x8xf32>
    %66 = vector.extract_strided_slice %15 {offsets = [8, 8], sizes = [8, 8], strides = [1, 1]} : vector<16x16xf32> to vector<8x8xf32>
    %cst_28 = arith.constant dense<0.000000e+00> : vector<8x8xf32>
    %67 = tpu.matmul %64, %65, %cst_28 {dimension_numbers = #tpu.dot_dimension_numbers<[1], [1], [0], [0], [0, 0, 1, 0], [], []>} : vector<8x8xf32>, vector<8x8xf32>, vector<8x8xf32> -> vector<8x8xf32>
    %cst_29 = arith.constant dense<0xFF800000> : vector<8xf32>
    %68 = vector.multi_reduction <maximumf>, %67, %cst_29 [1] : vector<8x8xf32> to vector<8xf32>
    %69 = vector.shape_cast %68 : vector<8xf32> to vector<8x1xf32>
    %70 = vector.broadcast %69 : vector<8x1xf32> to vector<8x8xf32>
    %71 = arith.subf %67, %70 : vector<8x8xf32>
    %72 = math.exp %71 : vector<8x8xf32>
    %cst_30 = arith.constant dense<0.000000e+00> : vector<8xf32>
    %73 = vector.multi_reduction <add>, %72, %cst_30 [1] : vector<8x8xf32> to vector<8xf32>
    %74 = vector.shape_cast %73 : vector<8xf32> to vector<8x1xf32>
    %75 = tpu.reciprocal %74 : vector<8x1xf32> -> vector<8x1xf32>
    %76 = vector.broadcast %75 : vector<8x1xf32> to vector<8x8xf32>
    %77 = arith.mulf %72, %76 : vector<8x8xf32>
    %cst_31 = arith.constant dense<0.000000e+00> : vector<8x8xf32>
    %78 = tpu.matmul %77, %66, %cst_31 {dimension_numbers = #tpu.dot_dimension_numbers<[1], [0], [0], [1], [0, 0, 1, 1], [], []>} : vector<8x8xf32>, vector<8x8xf32>, vector<8x8xf32> -> vector<8x8xf32>
    %c8_32 = arith.constant 8 : index
    %c8_33 = arith.constant 8 : index
    %79 = vector.load %arg12[%c8_32, %c8_33] : memref<16x16xf32, #tpu.memory_space<vmem>>, vector<8x8xf32>
    tpu.vector_store %arg12[%c8_32, %c8_33], %78 {strides = array<i32>} : memref<16x16xf32, #tpu.memory_space<vmem>>, vector<8x8xf32>,
    %c0_34 = arith.constant 0 : index
    %c0_35 = arith.constant 0 : index
    %80 = vector.load %arg12[%c0_34, %c0_35] : memref<16x16xf32, #tpu.memory_space<vmem>>, vector<16x16xf32>
    %c0_36 = arith.constant 0 : index
    %c0_37 = arith.constant 0 : index
    %81 = vector.load %arg6[%c0_36, %c0_37] : memref<16x16xf32, #tpu.memory_space<vmem>>, vector<16x16xf32>
    %cst_38 = arith.constant dense<0.000000e+00> : vector<16x16xf32>
    %82 = tpu.matmul %80, %81, %cst_38 {dimension_numbers = #tpu.dot_dimension_numbers<[1], [0], [0], [1], [0, 0, 1, 1], [], []>} : vector<16x16xf32>, vector<16x16xf32>, vector<16x16xf32> -> vector<16x16xf32>
    %c0_39 = arith.constant 0 : index
    %c0_40 = arith.constant 0 : index
    %83 = vector.load %arg7[%c0_39, %c0_40] : memref<1x16xf32, #tpu.memory_space<vmem>>, vector<1x16xf32>
    %84 = vector.broadcast %83 : vector<1x16xf32> to vector<16x16xf32>
    %85 = arith.addf %82, %84 : vector<16x16xf32>
    %c0_41 = arith.constant 0 : index
    %c0_42 = arith.constant 0 : index
    %86 = vector.load %arg10[%c0_41, %c0_42] : memref<1x1xf32, #tpu.memory_space<vmem>>, vector<1x1xf32>
    %87 = vector.broadcast %86 : vector<1x1xf32> to vector<16x16xf32>
    %88 = arith.mulf %87, %85 : vector<16x16xf32>
    %cst_43 = arith.constant 1.000000e+00 : f32
    %89 = vector.broadcast %cst_43 : f32 to vector<1x1xf32>
    %90 = arith.subf %89, %86 : vector<1x1xf32>
    %91 = vector.broadcast %90 : vector<1x1xf32> to vector<16x16xf32>
    %92 = arith.mulf %91, %5 : vector<16x16xf32>
    %93 = arith.addf %88, %92 : vector<16x16xf32>
    %c0_44 = arith.constant 0 : index
    %c0_45 = arith.constant 0 : index
    %94 = vector.load %arg8[%c0_44, %c0_45] : memref<16x32xf32, #tpu.memory_space<vmem>>, vector<16x32xf32>
    %cst_46 = arith.constant dense<0.000000e+00> : vector<16x32xf32>
    %95 = tpu.matmul %93, %94, %cst_46 {dimension_numbers = #tpu.dot_dimension_numbers<[1], [0], [0], [1], [0, 0, 1, 1], [], []>} : vector<16x16xf32>, vector<16x32xf32>, vector<16x32xf32> -> vector<16x32xf32>
    %c0_47 = arith.constant 0 : index
    %c0_48 = arith.constant 0 : index
    %96 = vector.load %arg9[%c0_47, %c0_48] : memref<1x32xf32, #tpu.memory_space<vmem>>, vector<1x32xf32>
    %97 = vector.broadcast %96 : vector<1x32xf32> to vector<16x32xf32>
    %98 = arith.addf %95, %97 : vector<16x32xf32>
    %99 = arith.addf %98, %0 : vector<16x32xf32>
    %c0_49 = arith.constant 0 : index
    %c0_50 = arith.constant 0 : index
    %100 = vector.load %arg11[%c0_49, %c0_50] : memref<16x32xf32, #tpu.memory_space<vmem>>, vector<16x32xf32>
    tpu.vector_store %arg11[%c0_49, %c0_50], %99 {strides = array<i32>} : memref<16x32xf32, #tpu.memory_space<vmem>>, vector<16x32xf32>,
    return
  }
  func.func @transform_0(%arg0: i32) -> (i32, i32) {
    %c0_i32 = arith.constant 0 : i32
    %c0_i32_0 = arith.constant 0 : i32
    return %arg0, %c0_i32 : i32, i32
  }
  func.func @transform_1(%arg0: i32) -> (i32, i32) {
    %c0_i32 = arith.constant 0 : i32
    %c0_i32_0 = arith.constant 0 : i32
    %c0_i32_1 = arith.constant 0 : i32
    return %c0_i32, %c0_i32_0 : i32, i32
  }
  func.func @transform_2(%arg0: i32) -> (i32, i32) {
    %c0_i32 = arith.constant 0 : i32
    %c0_i32_0 = arith.constant 0 : i32
    %c0_i32_1 = arith.constant 0 : i32
    return %c0_i32, %c0_i32_0 : i32, i32
  }
  func.func @transform_3(%arg0: i32) -> (i32, i32) {
    %c0_i32 = arith.constant 0 : i32
    %c0_i32_0 = arith.constant 0 : i32
    %c0_i32_1 = arith.constant 0 : i32
    return %c0_i32, %c0_i32_0 : i32, i32
  }
  func.func @transform_4(%arg0: i32) -> (i32, i32) {
    %c0_i32 = arith.constant 0 : i32
    %c0_i32_0 = arith.constant 0 : i32
    %c0_i32_1 = arith.constant 0 : i32
    return %c0_i32, %c0_i32_0 : i32, i32
  }
  func.func @transform_5(%arg0: i32) -> (i32, i32) {
    %c0_i32 = arith.constant 0 : i32
    %c0_i32_0 = arith.constant 0 : i32
    %c0_i32_1 = arith.constant 0 : i32
    return %c0_i32, %c0_i32_0 : i32, i32
  }
  func.func @transform_6(%arg0: i32) -> (i32, i32) {
    %c0_i32 = arith.constant 0 : i32
    %c0_i32_0 = arith.constant 0 : i32
    %c0_i32_1 = arith.constant 0 : i32
    return %c0_i32, %c0_i32_0 : i32, i32
  }
  func.func @transform_7(%arg0: i32) -> (i32, i32) {
    %c0_i32 = arith.constant 0 : i32
    %c0_i32_0 = arith.constant 0 : i32
    %c0_i32_1 = arith.constant 0 : i32
    return %c0_i32, %c0_i32_0 : i32, i32
  }
  func.func @transform_8(%arg0: i32) -> (i32, i32) {
    %c0_i32 = arith.constant 0 : i32
    %c0_i32_0 = arith.constant 0 : i32
    %c0_i32_1 = arith.constant 0 : i32
    return %c0_i32, %c0_i32_0 : i32, i32
  }
  func.func @transform_9(%arg0: i32) -> (i32, i32) {
    %c0_i32 = arith.constant 0 : i32
    %c0_i32_0 = arith.constant 0 : i32
    %c0_i32_1 = arith.constant 0 : i32
    return %c0_i32, %c0_i32_0 : i32, i32
  }
  func.func @transform_10(%arg0: i32) -> (i32, i32) {
    %c0_i32 = arith.constant 0 : i32
    %c0_i32_0 = arith.constant 0 : i32
    return %arg0, %c0_i32 : i32, i32
  }
}

</mosaic_0001>

<bundles_post_ra>
// kernel: tpu_custom_call.1
= control target key start
LH: loop header
LB: loop body
LE: loop exit
PB: predicated region body
PF: predicated region fallthrough
CT: control target
= control target key end

     0   :  { %s2217_s0 = inlined_call_operand.vmem [shape: f32[32,32], index: 0, kind: input, shape index: {}]   ;;  %s2218_s1 = inlined_call_operand.vmem [shape: f32[32,16], index: 1, kind: input, shape index: {}]   ;;  %s2219_s2 = inlined_call_operand.vmem [shape: f32[1,16], index: 2, kind: input, shape index: {}]   ;;  %s2220_s3 = inlined_call_operand.vmem [shape: f32[16,48], index: 3, kind: input, shape index: {}]   ;;  %s2221_s4 = inlined_call_operand.vmem [shape: f32[1,48], index: 4, kind: input, shape index: {}]   ;;  %s2222_s5 = inlined_call_operand.vmem [shape: f32[16,16], index: 5, kind: input, shape index: {}]   ;;  %s2223_s6 = inlined_call_operand.vmem [shape: f32[1,16], index: 6, kind: input, shape index: {}]   ;;  %s2224_s7 = inlined_call_operand.hbm [shape: f32[16,32], index: 7, kind: input, shape index: {}]   ;;  %s2225_s8 = inlined_call_operand.vmem [shape: f32[1,32], index: 8, kind: input, shape index: {}]   ;;  %s2226_s9 = inlined_call_operand.<no memory space> [shape: f32[1,1], index: 9, kind: input, shape index: {}]   ;;  %s2227_s10 = inlined_call_operand.hbm [shape: f32[32,32], index: 10, kind: output, shape index: {}]  }
   0x1   :  { %v15_v0 = vstv %s2226_s9 }
   0x2   :  { %16 = vst [vmem:[#allocation3] sm:$0x1] %v15_v0 }
   0x3   :  { %17 = vsyncpa [#allocation5], 0 }
   0x4   :  { %18 = vsyncpa [#allocation6], 0 }
   0x5   :  { %20 = vsyncpa [#allocation6 + $0x1], 0  ;;  %s1953_s15 = smov 0   ;;  %s1955_s16 = smov 0  }
   0x6   :  { %s1957_s17 = smov 0   ;;  %s1959_s18 = smov 0  }
   0x7 LB: > { %s1974_s9 = sadd.s32 4294967295, %s1879_s18   ;;  %s1540_s19 = sadd.s32 4294967294, %s1879_s18   ;;  %s1879_s18 = sphi %s1959_s18, %s2243_s18   ;;  %s1875_s17 = sphi %s1957_s17, %s2242_s17   ;;  %s1871_s16 = sphi %s1955_s16, %s2241_s16   ;;  %s1867_s15 = sphi %s1953_s15, %s2240_s15  }
   0x8   : > { %s1978_s20 = sadd.s32 1, %s1879_s18   ;;  %s248_s21 = sadd.s32 1, %s1875_s17 }
   0x9   : > { %s245_s22 = ssub.s32 %s1879_s18, %s1978_s20  ;;  %p258_p0 = scmp.ne.s32.totalorder %s1875_s17, %s1871_s16 }
   0xa   : > { %p246_p1 = scmp.eq.s32.totalorder %s245_s22, 0  ;;  %p259_p2 = scmp.eq.s32.totalorder %s1974_s9, 1 }
   0xb   : > { %p264_p3 = scmp.ne.s32.totalorder %s1871_s16, %s1867_s15  ;;  %p265_p4 = scmp.eq.s32.totalorder %s1540_s19, 1 }
   0xc   : > { %s1989_s23 = scalar_select %p246_p1, %s1875_s17, %s248_s21  }
   0xd   : > { %p1991_p5 = por %p259_p2, %p258_p0  ;;  %p1995_p6 = por %p265_p4, %p264_p3 }
   0xe   : > { %p1541_p7 = scmp.ge.s32.totalorder %s1879_s18, 1  ;;  %p272_p8 = scmp.lt.s32.totalorder %s1879_s18, 3 }
   0xf   : > { %s2231_s24 = scalar_select %p1991_p5, 1, 0 }
  0x10   : > { %s2232_s25 = scalar_select %p1995_p6, 1, 0 }
  0x11   : > { %p2228_p9 = scmp.eq.s32.totalorder %s1974_s9, 0  ;;  %p2002_p10 = pnand %p1541_p7, %p272_p8 }
  0x12   : > { %s1881_s27 = smov [#allocation4]   ;;  %s1785_s12 = scalar_lea.hbm %s2224_s7, 256 }
  0x13   : > { %s2233_s26 = scalar_select %p2002_p10, 1, 0 }
  0x14   : > { %s302_s28 = sshll.u32 %s1881_s27, 4  ;;  %p1711_p11 = pneg %p2002_p10  ;;  %s303_s28 = int_to_ptr.vmem [resolvable:$true] %s302_s28 }
  0x15   : > { %p1786_p13 = scmp.ne.s32.totalorder %s2224_s7, %s1785_s12  ;;  %p1792_p3 = scmp.lt.u32.totalorder %s1785_s12, %s2224_s7 }
  0x16   : > { %p2010_p12 = pnand %p2228_p9, %p1711_p11 }
  0x18   : > { %p1787_p0 = pneg %p2010_p12 }
  0x1a   : > { %p1788_p1 = pnand %p1787_p0, %p1786_p13 }
  0x1c   : > { %p1789_p2 = pneg %p1788_p1 }
  0x1e   : > { %p1794_p4 = pnand %p1792_p3, %p1789_p2 }
  0x20   : > { %1797 = shalt.err (!%p1794_p4)
}
  0x21   : > { %s1798_s22 = scalar_lea.vmem %s303_s28, 256  ;;  %p1806_p9 = scmp.lt.s32.totalorder %s303_s28, %s303_s28 }
  0x22   : > { %p1799_p7 = scmp.ne.s32.totalorder %s303_s28, %s1798_s22  ;;  %p1807_p6 = scmp.lt.s32.totalorder %s1798_s22, %s1798_s22 }
  0x24   : > { %p1801_p8 = pnand %p1799_p7, %p1787_p0  ;;  %p1808_p5 = por %p1807_p6, %p1806_p9 }
  0x26   : > { %p1802_p11 = pneg %p1801_p8 }
  0x28   : > { %p1809_p10 = pnand %p1808_p5, %p1802_p11 }
  0x2a   : > { %1812 = shalt.err (!%p1809_p10)
}
  0x2b   : > { %s1882_s27 = smov 128   ;;  %s1883_s30 = smov 8  }
  0x2c   : > { %1714 = dma.hbm_to_vmem [thread:$0]  (!%p2010_p12), %s2224_s7, 256, %s303_s28, [#allocation5], %s1882_s27, %s1882_s27, %s1883_s30  }
  0x2d   : > { %p2235_p13 = scmp.ne.s32.totalorder %s2233_s26, 0 }
  0x2e   : > { %p2236_p1 = scmp.eq.s32.totalorder (!%p2235_p13), %s1974_s9, 0 }
  0x2f   : > { %333 = sbr.rel (%p2235_p13) target bundleno = 1940 (0x794), region = 60 }
  0x36   : > { %1858 = dma.done.wait (%p2236_p1), [#allocation5], 256   ;;  %p2237_p0 = pmov %p2236_p1 }
  0x37   : > { %s1547_s12 = sshll.u32 %s1974_s9, 1  ;;  %vm391_vm0 = vcmask 261120   ;;  %v380_v1 = vld [vmem:[%s2218_s1] sm:$0xff]  ;;  %v381_v2 = vld [vmem:[%s2218_s1 + $0x8] sm:$0xff]  ;;  %v382_v3 = vld [vmem:[%s2218_s1 + $0x10] sm:$0xff]  ;;  %vm482_vm1 = vcmask 130048  }
  0x38   : > { %1860 = vsyncadd (%p2237_p0), [#allocation5], 4294967040  ;;  %p372_p5 = scmp.lt.s32.totalorder %s1547_s12, 3  ;;  %v1685_v4 = vpack.c.bf16 %v381_v2, %v380_v1  ;;  %v383_v5 = vld [vmem:[%s2218_s1 + $0x18] sm:$0xff]  ;;  %v473_v9 = vld [vmem:[%s2220_s3] sm:$0xff]  ;;  %v1884_v17 = vmov 0.0  }
  0x39   : > { %v1689_v7 = vpack.c.bf16 %v383_v5, %v382_v3  ;;  %v474_v10 = vld [vmem:[%s2220_s3 + $0x8] sm:$0xff]  ;;  %v1549_v12 = vld [vmem:[%s2219_s2] ss:$0 sm:$0xff]  ;;  %vm1885_vm2 = vmmov 0   ;;  %s1886_s30 = smov 112   ;;  %s1887_s11 = smov 120  }
  0x3a   : > { %s2245_s12 = smov (!%p372_p5, %s1547_s12), 3  ;;  %1686 = vmatprep.subr.bf16.mxu0 %v1685_v4  ;;  %v1693_v11 = vpack.c.bf16 %v474_v10, %v473_v9  ;;  %v1552_v18 = vld [vmem:[%s2221_s4] ss:$0 sm:$0xff]  ;;  %s1888_s13 = smov 104   ;;  %vm569_vm3 = vcmask 64512   ;;  %vm902_vm4 = vcmask 130112  }
  0x3b   : > { %s1548_s14 = sshll.u32 %s2245_s12, 3  ;;  %1688 = vmatpush3.bf16.msra.mxu0 %v1685_v4  ;;  %s1889_s12 = smov 96  }
  0x3c   : > { %s375_s21 = scalar_lea.vmem %s2217_s0, %s1548_s14  ;;  %1690 = vmatprep.subr.bf16.mxu0 %v1689_v7  ;;  %1694 = vmatprep.subr.bf16.mxu1 %v1693_v11  ;;  %s1890_s14 = smov 88  }
  0x3d   : > { %v2052_v6 = vld [vmem:[%s375_s21] sm:$0xff]  ;;  %v2056_v8 = vld [vmem:[%s375_s21 + $0x8] sm:$0xff]  ;;  %1696 = vmatpush3.bf16.msra.mxu1 %v1693_v11  ;;  %s1892_s26 = smov 8   ;;  %p2238_p9 = scmp.ne.s32.totalorder %s2231_s24, 0 }
  0x3e   : > { %1621 = vmatprep.mubr.msk.f32.mxu0 %vm391_vm0, %v2052_v6  ;;  %1631 = vmatprep.subr.mxu1 %v1884_v17 }
  0x3f   : > { %1692 = vmatpush3.bf16.msra.mxu0 %v1689_v7 }
  0x40   : > { %1636 = vmatprep.subr.mxu0 %v1884_v17 }
  0x42   : > { %1622 = vmatmul.mubr.msk.f32.vlgmr.msra.gmra.mrb[0].mxu0 %vm391_vm0, %v2056_v8 }
  0x43   : > { %1638 = vmatprep.mubr.msk.f32.mxu0 %vm1885_vm2, %v1884_v17 }
 0x115   : > { %v1623_v13 = vpop.f32.mrb[0].mxu0 }
 0x116   : > { %v464_v14 = vpop.f32.mrb[1].mxu0  ;;  %v2071_v16 = vadd.f32 %v1623_v13, %v1549_v12 }
 0x117   : > { %v2069_v15 = vadd.f32 %v1549_v12, %v464_v14 }
 0x119   : > { %1628 = vmatprep.mubr.msk.f32.mxu1 %vm482_vm1, %v2069_v15 }
 0x11a   : > { %1629 = vmatmul.mubr.msk.f32.vlgmr.msra.gmra.mrb[0].mxu1 %vm482_vm1, %v2071_v16 }
 0x11b   : > { %1633 = vmatprep.mubr.msk.f32.mxu1 %vm1885_vm2, %v1884_v17 }
 0x1ed   : > { %v1630_v19 = vpop.f32.mrb[0].mxu1 }
 0x1ee   : > { %v555_v20 = vpop.f32.mrb[1].mxu1  ;;  %v2090_v23 = vadd.f32 %v1630_v19, %v1552_v18 }
 0x1ef   : > { %v2086_v21 = vadd.f32 %v1552_v18, %v555_v20  ;;  %v1891_v20 = vmov 0  }
 0x1f0   : > { %v565_v24 = vmul.f32 0.35355338, %v2090_v23  ;;  %1768 = vset.pattern.permute.xlu1 %v1891_v20  ;;  %1767 = vset.pattern.permute.xlu0 %v1891_v20 }
 0x1f1   : > { %567 = vrot.lane.b32.xlu0 %v2086_v21, %s1886_s30  ;;  %v564_v22 = vmul.f32 0.35355338, %v2086_v21 }
 0x1f3   : > { %733 = vrot.lane.b32.xlu1 %v564_v22, %s1887_s11 }
 0x1f5   : > { %735 = vrot.lane.b32.xlu0 %v2086_v21, %s1888_s13 }
 0x1f7   : > { %905 = vrot.lane.b32.xlu1 %v2090_v23, %s1886_s30  ;;  %s368_s30 = sand.u32 1, %s1871_s16  }
 0x1f9   : > { %1072 = vrot.lane.b32.xlu0 %v2090_v23, %s1888_s13 }
 0x1fb   : > { %1070 = vrot.lane.b32.xlu1 %v565_v24, %s1887_s11  ;;  %s1546_s11 = sshll.u32 %s368_s30, 4 }
 0x1fc   : > { %s370_s19 = scalar_lea.vmem [#allocation7], %s1546_s11  ;;  %s1893_s11 = smov [#allocation7]  }
 0x1fd   : > { %s1466_s29 = sshll.u32 %s370_s19, 4  ;;  %s1817_s13 = sshll.u32 %s1893_s11, 4  ;;  %s2171_s29 = int_to_ptr.vmem [resolvable:$true] %s1466_s29  ;;  %s1818_s13 = int_to_ptr.vmem [resolvable:$false] %s1817_s13 }
 0x1fe   : > { %s1813_s27 = scalar_lea.vmem %s2171_s29, 256  ;;  %p1820_p2 = scmp.lt.s32.totalorder %s2171_s29, %s1818_s13 }
 0x1ff   : > { %p1814_p6 = scmp.ne.s32.totalorder %s2171_s29, %s1813_s27 }
 0x201   : > { %p1815_p10 = pnand %p1814_p6, %p2238_p9 }
 0x203   : > { %p1816_p12 = pneg %p1815_p10 }
 0x263   : > { %v568_v25 = vpop.permute.xlu0 %567 }
 0x264   : > { %1632 = vmatpush3.xpose.msk.msra.mxu1 %vm569_vm3, %v568_v25  ;;  %v1334_v25 = vlaneseq }
 0x265   : > { %v734_v26 = vpop.permute.xlu1 %733  ;;  %1641 = vmatprep.subr.mxu1 %v1884_v17 }
 0x267   : > { %v736_v27 = vpop.permute.xlu0 %735  ;;  %1634 = vmatmul.mubr.msk.f32.vlgmr.msra.gmra.mrb[2].mxu1 %vm569_vm3, %v564_v22  ;;  %v1242_v22 = vld [vmem:[%s2222_s5] sm:$0xff] }
 0x268   : > { %1642 = vmatpush3.xpose.msk.msra.mxu1 %vm569_vm3, %v736_v27  ;;  %1643 = vmatprep.mubr.msk.f32.mxu1 %vm1885_vm2, %v1884_v17 }
 0x269   : > { %1651 = vmatprep.subr.mxu1 %v1884_v17  ;;  %v906_v28 = vpop.permute.xlu1 %905 }
 0x26b   : > { %1644 = vmatmul.mubr.msk.f32.vlgmr.msra.gmra.mrb[4].mxu1 %vm569_vm3, %v734_v26  ;;  %v1073_v29 = vpop.permute.xlu0 %1072 }
 0x26c   : > { %1652 = vmatpush3.xpose.msk.msra.mxu1 %vm569_vm3, %v906_v28  ;;  %1653 = vmatprep.mubr.msk.f32.mxu1 %vm1885_vm2, %v1884_v17  ;;  %v1335_v28 = vshrl.u32 %v1334_v25, 7 }
 0x26d   : > { %1661 = vmatprep.subr.mxu1 %v1884_v17  ;;  %v1071_v30 = vpop.permute.xlu1 %1070 }
 0x26f   : > { %1654 = vmatmul.mubr.msk.f32.vlgmr.msra.gmra.mrb[6].mxu1 %vm569_vm3, %v565_v24 }
 0x270   : > { %1662 = vmatpush3.xpose.msk.msra.mxu1 %vm569_vm3, %v1073_v29  ;;  %1663 = vmatprep.mubr.msk.f32.mxu1 %vm1885_vm2, %v1884_v17  ;;  %v1332_v29 = vld [vmem:[#allocation3] sm:$0x1] }
 0x273   : > { %1664 = vmatmul.mubr.msk.f32.vlgmr.msra.gmra.mrb[8].mxu1 %vm569_vm3, %v1071_v30 }
 0x33a   : > { %v641_v31 = vpop.f32.mrb[2].mxu1 }
 0x33b   : > { %v1635_v32 = vpop.f32.mrb[3].mxu1  ;;  %v645_v33 = vsel %vm569_vm3, %v641_v31, -inf }
 0x33c   : > { %646 = vmax.xlane.f32.xlu0 %v645_v33  ;;  %v1336_v32 = vsub.s32 0, %v1335_v28  ;;  %v1344_v33 = vsub.f32 1.0, %v1332_v29 }
 0x33e   : > { %v807_v34 = vpop.f32.mrb[4].mxu1 }
 0x33f   : > { %v1645_v35 = vpop.f32.mrb[5].mxu1  ;;  %v811_v36 = vsel %vm569_vm3, %v807_v34, -inf }
 0x340   : > { %812 = vmax.xlane.f32.xlu1 %v811_v36  ;;  %v1349_v36 = vrot.slane %v1344_v33, %v1336_v32 }
 0x342   : > { %v978_v37 = vpop.f32.mrb[6].mxu1 }
 0x343   : > { %v1655_v38 = vpop.f32.mrb[7].mxu1  ;;  %v982_v39 = vsel %vm569_vm3, %v978_v37, -inf }
 0x344   : > { %983 = vmax.xlane.f32.xlu0 %v982_v39 }
 0x346   : > { %v1144_v40 = vpop.f32.mrb[8].mxu1 }
 0x347   : > { %v1665_v41 = vpop.f32.mrb[9].mxu1  ;;  %v1148_v42 = vsel %vm569_vm3, %v1144_v40, -inf }
 0x348   : > { %1149 = vmax.xlane.f32.xlu0 %v1148_v42  ;;  %v1358_v42 = vld [vmem:[#allocation4] sm:$0xff] }
 0x351   : > { %656 = vrot.lane.b32.xlu1 %v2086_v21, %s1889_s12 }
 0x3c9   : > { %v647_v43 = vpop.xlane.xlu0 %646 }
 0x3ca   : > { %v648_v44 = vsub.f32 %v641_v31, %v647_v43  ;;  %v1359_v43 = vld [vmem:[#allocation4 + $0x8] sm:$0xff] }
 0x3cc   : > { %v649_v45 = vmul.f32 1.442695, %v648_v44  ;;  %v1701_v44 = vpack.c.bf16 %v1359_v43, %v1358_v42 }
 0x3cd   : > { %v813_v46 = vpop.xlane.xlu1 %812 }
 0x3ce   : > { %1769 = vpow2.f32 %v649_v45  ;;  %v814_v47 = vsub.f32 %v807_v34, %v813_v46  ;;  %v1567_v45 = vld [vmem:[%s2223_s6] ss:$0 sm:$0xff] }
 0x3d0   : > { %v815_v48 = vmul.f32 1.442695, %v814_v47 }
 0x3d1   : > { %v657_v49 = vpop.permute.xlu1 %656  ;;  %v984_v50 = vpop.xlane.xlu0 %983 }
 0x3d2   : > { %1771 = vpow2.f32 %v815_v48  ;;  %v985_v51 = vsub.f32 %v978_v37, %v984_v50  ;;  %1637 = vmatpush3.msra.mxu0 %v657_v49  ;;  %v1337_v37 = vrot.slane %v1332_v29, %v1336_v32 }
 0x3d3   : > { %1646 = vmatprep.subr.mxu0 %v1884_v17 }
 0x3d4   : > { %v986_v52 = vmul.f32 1.442695, %v985_v51 }
 0x3d5   : > { %v1150_v53 = vpop.xlane.xlu0 %1149 }
 0x3d6   : > { %1773 = vpow2.f32 %v986_v52  ;;  %v1151_v54 = vsub.f32 %v1144_v40, %v1150_v53 }
 0x3d8   : > { %v1770_v55 = vpop.eup %1769  ;;  %v1152_v56 = vmul.f32 1.442695, %v1151_v54 }
 0x3d9   : > { %v651_v57 = vsel %vm569_vm3, %v1770_v55, 0.0 }
 0x3da   : > { %1775 = vpow2.f32 %v1152_v56  ;;  %652 = vadd.xlane.f32.xlu1 %v651_v57 }
 0x3dc   : > { %v1772_v58 = vpop.eup %1771 }
 0x3dd   : > { %v817_v59 = vsel %vm569_vm3, %v1772_v58, 0.0 }
 0x3de   : > { %818 = vadd.xlane.f32.xlu0 %v817_v59 }
 0x3e0   : > { %v1774_v60 = vpop.eup %1773 }
 0x3e1   : > { %v988_v61 = vsel %vm569_vm3, %v1774_v60, 0.0 }
 0x3e2   : > { %989 = vadd.xlane.f32.xlu1 %v988_v61 }
 0x3e4   : > { %v1776_v62 = vpop.eup %1775 }
 0x3e5   : > { %v1154_v63 = vsel %vm569_vm3, %v1776_v62, 0.0 }
 0x3e6   : > { %1155 = vadd.xlane.f32.xlu0 %v1154_v63 }
 0x3f3   : > { %993 = vrot.lane.b32.xlu1 %v2090_v23, %s1889_s12  ;;  %s1819_s12 = scalar_lea.vmem %s1818_s13, 512 }
 0x3f4   : > { %p1821_p3 = scmp.lt.s32.totalorder %s1819_s12, %s1813_s27 }
 0x3f6   : > { %p1822_p4 = por %p1821_p3, %p1820_p2 }
 0x3f7   : > { %1159 = vrot.lane.b32.xlu1 %v2090_v23, %s1890_s14  ;;  %v1243_v23 = vld [vmem:[%s2222_s5 + $0x8] sm:$0xff] }
 0x3f8   : > { %p1823_p7 = pnand %p1822_p4, %p1816_p12 }
 0x3fc   : > { %822 = vrot.lane.b32.xlu0 %v2086_v21, %s1890_s14  ;;  %s1578_s14 = sshll.u32 %s1974_s9, 8  ;;  %s2175_s9 = scalar_lea.sflag [#allocation6], %s368_s30 }
 0x3fd   : > { %s2168_s21 = scalar_lea.hbm %s2227_s10, %s1578_s14 }
 0x467   : > { %v653_v0 = vpop.xlane.xlu1 %652 }
 0x468   : > { %1777 = vrcp.f32 %v653_v0 }
 0x46b   : > { %v819_v1 = vpop.xlane.xlu0 %818 }
 0x46c   : > { %1779 = vrcp.f32 %v819_v1 }
 0x46f   : > { %v990_v2 = vpop.xlane.xlu1 %989 }
 0x470   : > { %1781 = vrcp.f32 %v990_v2 }
 0x472   : > { %v1778_v3 = vpop.eup %1777 }
 0x473   : > { %v655_v4 = vmul.f32 %v1778_v3, %v1770_v55  ;;  %v1156_v5 = vpop.xlane.xlu0 %1155  ;;  %v994_v10 = vpop.permute.xlu1 %993 }
 0x474   : > { %1783 = vrcp.f32 %v1156_v5 }
 0x475   : > { %1639 = vmatmul.mubr.msk.f32.vlgmr.msra.gmra.mrb[2].mxu0 %vm569_vm3, %v655_v4 }
 0x476   : > { %v1780_v7 = vpop.eup %1779  ;;  %1648 = vmatprep.mubr.msk.f32.mxu0 %vm1885_vm2, %v1884_v17 }
 0x477   : > { %v821_v9 = vmul.f32 %v1780_v7, %v1772_v58  ;;  %v823_v11 = vpop.permute.xlu0 %822  ;;  %v1160_v14 = vpop.permute.xlu1 %1159  ;;  %v1570_v58 = vld [vmem:[%s2225_s8] ss:$0 sm:$0xff] }
 0x478   : > { %1647 = vmatpush3.msra.mxu0 %v823_v11 }
 0x479   : > { %1649 = vmatmul.mubr.msk.f32.vlgmr.msra.gmra.mrb[4].mxu0 %vm569_vm3, %v821_v9  ;;  %1656 = vmatprep.subr.mxu0 %v1884_v17 }
 0x47a   : > { %v1782_v12 = vpop.eup %1781  ;;  %1657 = vmatpush3.msra.mxu0 %v994_v10  ;;  %1658 = vmatprep.mubr.msk.f32.mxu0 %vm1885_vm2, %v1884_v17 }
 0x47b   : > { %v992_v13 = vmul.f32 %v1782_v12, %v1774_v60  ;;  %1666 = vmatprep.subr.mxu0 %v1884_v17 }
 0x47d   : > { %1659 = vmatmul.mubr.msk.f32.vlgmr.msra.gmra.mrb[6].mxu0 %vm569_vm3, %v992_v13 }
 0x47e   : > { %v1784_v18 = vpop.eup %1783  ;;  %1667 = vmatpush3.msra.mxu0 %v1160_v14  ;;  %1668 = vmatprep.mubr.msk.f32.mxu0 %vm1885_vm2, %v1884_v17  ;;  %v1697_v17 = vpack.c.bf16 %v1243_v23, %v1242_v22 }
 0x47f   : > { %v1158_v19 = vmul.f32 %v1784_v18, %v1776_v62  ;;  %1702 = vmatprep.subr.bf16.mxu0 %v1701_v44 }
 0x480   : > { %1698 = vmatprep.subr.bf16.mxu1 %v1697_v17 }
 0x481   : > { %1669 = vmatmul.mubr.msk.f32.vlgmr.msra.gmra.mrb[8].mxu0 %vm569_vm3, %v1158_v19  ;;  %1700 = vmatpush3.bf16.msra.mxu1 %v1697_v17 }
 0x482   : > { %1704 = vmatpush3.bf16.msra.mxu0 %v1701_v44 }
 0x548   : > { %v728_v21 = vpop.f32.mrb[2].mxu0 }
 0x549   : > { %732 = vst.msk [vmem:[#allocation2] sm:$0xff] %vm569_vm3, %v728_v21  ;;  %v1640_v24 = vpop.f32.mrb[3].mxu0 }
 0x54c   : > { %v894_v26 = vpop.f32.mrb[4].mxu0 }
 0x54d   : > { %899 = vrot.lane.b32.xlu0 %v894_v26, %s1892_s26  ;;  %v1650_v27 = vpop.f32.mrb[5].mxu0 }
 0x550   : > { %v1065_v30 = vpop.f32.mrb[6].mxu0 }
 0x551   : > { %1069 = vst.msk [vmem:[#allocation2 + $0x8] sm:$0xff] %vm569_vm3, %v1065_v30  ;;  %v1660_v31 = vpop.f32.mrb[7].mxu0  ;;  %1339 = vperm.xlu0 %1767, %v1337_v37  }
 0x554   : > { %v1231_v34 = vpop.f32.mrb[8].mxu0 }
 0x555   : > { %1236 = vrot.lane.b32.xlu1 %v1231_v34, %s1892_s26  ;;  %v1670_v35 = vpop.f32.mrb[9].mxu0 }
 0x559   : > { %1351 = vperm.xlu1 %1768, %v1349_v36  }
 0x5bf   : > { %v900_v38 = vpop.permute.xlu0 %899 }
 0x5c0   : > { %903 = vst.msk [vmem:[#allocation2] sm:$0xff] %vm902_vm4, %v900_v38 }
 0x5c7   : > { %v1237_v39 = vpop.permute.xlu1 %1236  ;;  %v1240_v40 = vld [vmem:[#allocation2] sm:$0xff] }
 0x5c8   : > { %1239 = vst.msk [vmem:[#allocation2 + $0x8] sm:$0xff] %vm902_vm4, %v1237_v39  ;;  %1675 = vmatprep.mubr.msk.f32.mxu1 %vm482_vm1, %v1240_v40 }
 0x5cf   : > { %v1241_v41 = vld [vmem:[#allocation2 + $0x8] sm:$0xff] }
 0x5d0   : > { %1676 = vmatmul.mubr.msk.f32.vlgmr.msra.gmra.mrb[10].mxu1 %vm482_vm1, %v1241_v41  ;;  %v1340_v47 = vpop.permute.xlu0 %1339 }
 0x5d8   : > { %v1352_v48 = vpop.permute.xlu1 %1351 }
 0x5d9   : > { %v1354_v53 = vmul.f32 %v1352_v48, %v2069_v15  ;;  %v1355_v55 = vmul.f32 %v1352_v48, %v2071_v16 }
 0x6a3   : > { %v1677_v46 = vpop.f32.mrb[10].mxu1 }
 0x6a4   : > { %v1329_v49 = vadd.f32 %v1677_v46, %v1567_v45  ;;  %v1323_v50 = vpop.f32.mrb[11].mxu1 }
 0x6a5   : > { %v1324_v51 = vadd.f32 %v1567_v45, %v1323_v50 }
 0x6a6   : > { %v1343_v52 = vmul.f32 %v1340_v47, %v1329_v49 }
 0x6a7   : > { %v1342_v54 = vmul.f32 %v1340_v47, %v1324_v51 }
 0x6a8   : > { %v1357_v57 = vadd.f32 %v1355_v55, %v1343_v52 }
 0x6a9   : > { %v1356_v56 = vadd.f32 %v1354_v53, %v1342_v54 }
 0x6ab   : > { %1682 = vmatprep.mubr.msk.f32.mxu0 %vm482_vm1, %v1356_v56 }
 0x6ac   : > { %1683 = vmatmul.mubr.msk.f32.vlgmr.msra.gmra.mrb[10].mxu0 %vm482_vm1, %v1357_v57 }
 0x77f   : > { %v1684_v59 = vpop.f32.mrb[10].mxu0 }
 0x780   : > { %v1445_v60 = vadd.f32 %v1684_v59, %v1570_v58  ;;  %v1439_v15 = vpop.f32.mrb[11].mxu0 }
 0x781   : > { %v1440_v16 = vadd.f32 %v1570_v58, %v1439_v15 }
 0x782   : > { %v1449_v61 = vadd.f32 %v1445_v60, %v2056_v8 }
 0x783   : > { %v1448_v62 = vadd.f32 %v1440_v16, %v2052_v6 }
 0x784   : > { %1451 = vst.msk [vmem:[%s370_s19 + $0x8] sm:$0xff] %vm391_vm0, %v1449_v61 }
 0x785   : > { %1450 = vst.msk [vmem:[%s370_s19] sm:$0xff] %vm391_vm0, %v1448_v62 }
 0x786   : > { %1826 = shalt.err (!%p1823_p7)
}
 0x787   : > { %s1827_s30 = scalar_lea.hbm %s2168_s21, 256  ;;  %s1831_s28 = scalar_lea.hbm %s2227_s10, 512 }
 0x788   : > { %p1828_p8 = scmp.ne.s32.totalorder %s2168_s21, %s1827_s30  ;;  %p1832_p1 = scmp.lt.u32.totalorder %s2168_s21, %s2227_s10 }
 0x789   : > { %p1833_p0 = scmp.lt.u32.totalorder %s1831_s28, %s1827_s30  ;;  %p1835_p6 = scmp.lt.u32.totalorder %s1827_s30, %s2168_s21 }
 0x78a   : > { %p1829_p11 = pnand %p1828_p8, %p2238_p9 }
 0x78b   : > { %p1834_p5 = por %p1833_p0, %p1832_p1 }
 0x78c   : > { %p1830_p13 = pneg %p1829_p11 }
 0x78d   : > { %p1836_p10 = por %p1835_p6, %p1834_p5 }
 0x78f   : > { %p1837_p12 = pnand %p1836_p10, %p1830_p13 }
 0x791   : > { %1840 = shalt.err (!%p1837_p12)
}
 0x792   : > { %s1894_s27 = smov 128  }
 0x793   : > { %1709 = dma.vmem_to_hbm [thread:$0]  (%p2238_p9), %s2171_s29, 256, %s2168_s21, %s2175_s9, %s1894_s27, %s1894_s27, %s1892_s26  }
 0x794 PF: > { %p1721_p2 = scmp.ge.s32.totalorder %s1879_s18, 2  ;;  %s1481_s13 = sand.u32 1, %s1867_s15  }
 0x795   : > { %p2239_p3 = scmp.ne.s32.totalorder %s2232_s25, 0  ;;  %s1482_s12 = scalar_lea.sflag [#allocation6], %s1481_s13 }
 0x797   : > { %p1716_p4 = pnand %p1721_p2, %p2239_p3 }
 0x799   : > { %1862 = dma.done.wait (!%p1716_p4), %s1482_s12, 256  }
 0x79a   : > { %1864 = vsyncadd (!%p1716_p4), %s1482_s12, 4294967040  ;;  %p23_p7 = scmp.ge.s32.totalorder %s1978_s20, 4   ;;  %s2240_s15 = smov %s1871_s16 }
 0x79b   : > { %s2241_s16 = smov %s1875_s17  ;;  %s2242_s17 = smov %s1989_s23 }
 0x79c   : > { %s2243_s18 = smov %s1978_s20  ;;  %25 = sbr.rel (!%p23_p7) target bundleno = 7 (0x7), region = 100 }
 0x7a3   :  { %1487 = vsyncpa [#allocation5], 1 }
 0x7a4   :  { %1489 = vsyncpa [#allocation5 + $0x1], 1 }
 0x7a5   :  { %1490 = vsyncpa [#allocation6], 1 }
 0x7a6   :  { %1492 = vsyncpa [#allocation6 + $0x1], 1 }

</bundles_post_ra>
